<compile_context>
chip_gen: v7x
topology: tpu7x:2x2x1
jax: 0.10.0
libtpu: 0.0.40
codegen_flags: <defaults>
</compile_context>

<pallas_src>
import math

import jax
import jax.numpy as jnp
from jax.experimental import pallas as pl
from jax.experimental.pallas import tpu as pltpu


def _add_pe_kernel(x_ref, pe_ref, o_ref):
    # x_ref / o_ref : (Bt, tile_s, D) blocks
    # pe_ref        : (tile_s, D) block, broadcast over the batch chunk
    o_ref[...] = (x_ref[...] + pe_ref[...]).astype(o_ref.dtype)


def _make_pe_table(S, D, dtype):
    """(S, D) sinusoidal table, built in f32, cast once to the add dtype."""
    position = jnp.arange(S, dtype=jnp.float32)[:, None]                      # (S, 1)
    div_term = jnp.exp(
        jnp.arange(0, D, 2, dtype=jnp.float32) * -(math.log(10000.0) / D)
    )                                                                          # (D//2,)
    ang = position * div_term                                                  # (S, D//2)
    pe = jnp.zeros((S, D), jnp.float32)
    pe = pe.at[:, 0::2].set(jnp.sin(ang))
    pe = pe.at[:, 1::2].set(jnp.cos(ang))
    return pe.astype(dtype)


def _choose_tiles(B, S, D, itemsize, target_bytes=2 << 20):
    """Pick (batch_tile, seq_tile) so a streamed x-block is ~target_bytes."""
    row_bytes = D * itemsize
    max_rows = max(8, target_bytes // row_bytes)   # rows of (.., D) per block
    if S <= max_rows:
        # Full-extent sequence block (always legal, any S); fold batch rows in
        # so tiny-S / large-B shapes still move ~MiB-sized DMAs per grid step.
        tile_s = S
        bt = max(1, min(B, int(max_rows // max(S, 1))))
    else:
        # Large S: tile the sequence dim (multiple of 8), cdiv grid handles the
        # partial last block — tile size never degrades for awkward S.
        tile_s = max(8, int(max_rows // 8) * 8)
        bt = 1
    return bt, tile_s


def position_encodings(x, d_model):
    """x: (B, S, D) with D == d_model. Returns dropout_{p=0}(x + pe[:, :S]) = x + pe[:, :S]."""
    B, S, D = x.shape
    assert D == d_model

    itemsize = jnp.dtype(x.dtype).itemsize
    # bf16/fp16 inputs: add natively in that dtype (v6e/v7x VALU is bf16-native,
    # halves PE VMEM).  f32 inputs keep an exact f32 PE table.
    pe_dtype = x.dtype if itemsize < 4 else jnp.float32
    pe = _make_pe_table(S, D, pe_dtype)

    bt, tile_s = _choose_tiles(B, S, D, itemsize)
    n_seq = pl.cdiv(S, tile_s)
    n_bat = pl.cdiv(B, bt)

    # VMEM footprint: double-buffered x + out blocks, double-buffered PE block.
    x_block = bt * tile_s * D * itemsize
    pe_block = tile_s * D * jnp.dtype(pe_dtype).itemsize
    footprint = 2 * (2 * x_block + pe_block)
    vmem_limit = int(min(max(2 * footprint, 8 << 20), 32 << 20))
    vmem_limit = int(max(vmem_limit, footprint + (2 << 20)))   # never below usage

    return pl.pallas_call(
        _add_pe_kernel,
        out_shape=jax.ShapeDtypeStruct((B, S, D), x.dtype),
        grid_spec=pltpu.PrefetchScalarGridSpec(
            num_scalar_prefetch=0,
            grid=(n_seq, n_bat),  # batch inner-most: PE block index unchanged -> DMA reused
            in_specs=[
                pl.BlockSpec((bt, tile_s, D), lambda s, b: (b, s, 0)),
                pl.BlockSpec((tile_s, D), lambda s, b: (s, 0)),
            ],
            out_specs=pl.BlockSpec((bt, tile_s, D), lambda s, b: (b, s, 0)),
        ),
        compiler_params=pltpu.CompilerParams(
            dimension_semantics=("parallel", "parallel"),
            vmem_limit_bytes=vmem_limit,
        ),
    )(x, pe)


def _reference(x, d_model, max_len=5000):
    # Pure-JAX mirror of the PyTorch __init__ + forward (dropout p=0).
    pe = jnp.zeros((max_len, d_model), jnp.float32)
    position = jnp.arange(0, max_len, dtype=jnp.float32)[:, None]
    div_term = jnp.exp(
        jnp.arange(0, d_model, 2, dtype=jnp.float32) * -(math.log(10000.0) / d_model)
    )
    pe = pe.at[:, 0::2].set(jnp.sin(position * div_term))
    pe = pe.at[:, 1::2].set(jnp.cos(position * div_term))
    pe = pe[None]  # (1, max_len, d_model)
    return x.astype(jnp.float32) + pe[:, : x.shape[1]]


if __name__ == "__main__":
    d_model = 512  # matches `pe = PositionEncodings(512, 0)`
    key = jax.random.PRNGKey(0)

    # Test 1: f32, the canonical small shape.
    B, S = 2, 8
    x = jax.random.normal(key, (B, S, d_model), dtype=jnp.float32)
    out = jax.block_until_ready(position_encodings(x, d_model))
    ref = _reference(x, d_model)
    assert out.shape == (B, S, d_model)
    assert jnp.allclose(out, ref, atol=1e-5, rtol=1e-5), "f32 mismatch vs reference"

    # Test 2: bf16 input, non-multiple-of-8 sequence, batch-folded blocks.
    B2, S2 = 3, 20
    x2 = jax.random.normal(jax.random.fold_in(key, 1), (B2, S2, d_model), dtype=jnp.bfloat16)
    out2 = jax.block_until_ready(position_encodings(x2, d_model))
    ref2 = _reference(x2, d_model)
    assert out2.shape == (B2, S2, d_model)
    assert jnp.allclose(out2.astype(jnp.float32), ref2, atol=3e-2, rtol=3e-2), "bf16 mismatch"

    print("KERNEL_OK")
</pallas_src>

<mosaic_0001>
module attributes {stable_mosaic.version = 11 : i64} {
  func.func @_add_pe_kernel(%arg0: i32, %arg1: i32, %arg2: memref<2x8x512xf32, #tpu.memory_space<vmem>>, %arg3: memref<8x512xf32, #tpu.memory_space<vmem>>, %arg4: memref<2x8x512xf32, #tpu.memory_space<vmem>>) attributes {dimension_semantics = [#tpu.dimension_semantics<parallel>, #tpu.dimension_semantics<parallel>], iteration_bounds = array<i64: 1, 1>, scalar_prefetch = 0 : i64, scratch_operands = 0 : i64, tpu.core_type = #tpu.core_type<tc>, window_params = [{transform_indices = @transform_0, window_bounds = array<i64: 2, 8, 512>}, {transform_indices = @transform_1, window_bounds = array<i64: 8, 512>}, {transform_indices = @transform_2, window_bounds = array<i64: 2, 8, 512>}]} {
    %c0 = arith.constant 0 : index
    %c0_0 = arith.constant 0 : index
    %c0_1 = arith.constant 0 : index
    %0 = vector.load %arg2[%c0, %c0_0, %c0_1] : memref<2x8x512xf32, #tpu.memory_space<vmem>>, vector<2x8x512xf32>
    %c0_2 = arith.constant 0 : index
    %c0_3 = arith.constant 0 : index
    %1 = vector.load %arg3[%c0_2, %c0_3] : memref<8x512xf32, #tpu.memory_space<vmem>>, vector<8x512xf32>
    %2 = vector.shape_cast %1 : vector<8x512xf32> to vector<1x8x512xf32>
    %3 = vector.broadcast %2 : vector<1x8x512xf32> to vector<2x8x512xf32>
    %4 = arith.addf %0, %3 : vector<2x8x512xf32>
    %c0_4 = arith.constant 0 : index
    %c0_5 = arith.constant 0 : index
    %c0_6 = arith.constant 0 : index
    %5 = vector.load %arg4[%c0_4, %c0_5, %c0_6] : memref<2x8x512xf32, #tpu.memory_space<vmem>>, vector<2x8x512xf32>
    tpu.vector_store %arg4[%c0_4, %c0_5, %c0_6], %4 {strides = array<i32>} : memref<2x8x512xf32, #tpu.memory_space<vmem>>, vector<2x8x512xf32>,
    return
  }
  func.func @transform_0(%arg0: i32, %arg1: i32) -> (i32, i32, i32) {
    %c0_i32 = arith.constant 0 : i32
    %c0_i32_0 = arith.constant 0 : i32
    return %arg1, %arg0, %c0_i32 : i32, i32, i32
  }
  func.func @transform_1(%arg0: i32, %arg1: i32) -> (i32, i32) {
    %c0_i32 = arith.constant 0 : i32
    %c0_i32_0 = arith.constant 0 : i32
    return %arg0, %c0_i32 : i32, i32
  }
  func.func @transform_2(%arg0: i32, %arg1: i32) -> (i32, i32, i32) {
    %c0_i32 = arith.constant 0 : i32
    %c0_i32_0 = arith.constant 0 : i32
    return %arg1, %arg0, %c0_i32 : i32, i32, i32
  }
}

</mosaic_0001>

<bundles_post_ra>
// kernel: tpu_custom_call.1
= control target key start
LH: loop header
LB: loop body
LE: loop exit
PB: predicated region body
PF: predicated region fallthrough
CT: control target
= control target key end

     0   :  { %7 = vsyncpa [#allocation3], 0  ;;  %s223_s0 = inlined_call_operand.hbm [shape: f32[2,8,512], index: 0, kind: input, shape index: {}]   ;;  %s224_s1 = inlined_call_operand.hbm [shape: f32[8,512], index: 1, kind: input, shape index: {}]   ;;  %s225_s2 = inlined_call_operand.hbm [shape: f32[2,8,512], index: 2, kind: output, shape index: {}]  }
   0x1   :  { %8 = vsyncpa [#allocation6], 0 }
   0x2   :  { %9 = vsyncpa [#allocation4], 0  ;;  %s161_s9 = smov [#allocation2]   ;;  %s89_s13 = scalar_lea.hbm %s223_s0, 1024 }
   0x3   :  { %s15_s10 = sshll.u32 %s161_s9, 4  ;;  %p90_p0 = scmp.ne.s32.totalorder %s223_s0, %s89_s13  ;;  %s16_s10 = int_to_ptr.vmem [resolvable:$true] %s15_s10 }
   0x4   :  { %p93_p1 = scmp.lt.u32.totalorder %s89_s13, %s223_s0 }
   0x6   :  { %p95_p2 = pnand %p93_p1, %p90_p0 }
   0x8   :  { %98 = shalt.err (!%p95_p2)
}
   0x9   :  { %s99_s18 = scalar_lea.vmem %s16_s10, 1024  ;;  %p104_p4 = scmp.lt.s32.totalorder %s16_s10, %s16_s10 }
   0xa   :  { %p100_p3 = scmp.ne.s32.totalorder %s16_s10, %s99_s18  ;;  %p105_p5 = scmp.lt.s32.totalorder %s99_s18, %s99_s18 }
   0xc   :  { %p106_p6 = por %p105_p5, %p104_p4 }
   0xe   :  { %p107_p7 = pnand %p106_p6, %p100_p3 }
  0x10   :  { %110 = shalt.err (!%p107_p7)
}
  0x11   :  { %s162_s19 = smov 512   ;;  %s163_s20 = smov 32  }
  0x12   :  { %21 = dma.hbm_to_vmem [thread:$0]  %s223_s0, 1024, %s16_s10, [#allocation3], %s162_s19, %s162_s19, %s163_s20  }
  0x13   :  { %s164_s23 = smov [#allocation5]   ;;  %s111_s27 = scalar_lea.hbm %s224_s1, 512 }
  0x14   :  { %s28_s24 = sshll.u32 %s164_s23, 4  ;;  %p112_p8 = scmp.ne.s32.totalorder %s224_s1, %s111_s27  ;;  %s29_s24 = int_to_ptr.vmem [resolvable:$true] %s28_s24 }
  0x15   :  { %p115_p9 = scmp.lt.u32.totalorder %s111_s27, %s224_s1 }
  0x17   :  { %p117_p10 = pnand %p115_p9, %p112_p8 }
  0x19   :  { %120 = shalt.err (!%p117_p10)
}
  0x1a   :  { %s121_s4 = scalar_lea.vmem %s29_s24, 512  ;;  %p126_p12 = scmp.lt.s32.totalorder %s29_s24, %s29_s24 }
  0x1b   :  { %p122_p11 = scmp.ne.s32.totalorder %s29_s24, %s121_s4  ;;  %p127_p13 = scmp.lt.s32.totalorder %s121_s4, %s121_s4 }
  0x1d   :  { %p128_p0 = por %p127_p13, %p126_p12 }
  0x1f   :  { %p129_p1 = pnand %p128_p0, %p122_p11 }
  0x21   :  { %132 = shalt.err (!%p129_p1)
}
  0x22   :  { %31 = dma.hbm_to_vmem [thread:$0]  %s224_s1, 512, %s29_s24, [#allocation6]  }
  0x23   :  { %155 = dma.done.wait [#allocation3], 1024  }
  0x24   :  { %156 = vsyncadd [#allocation3], 4294966272 }
  0x25   :  { %157 = dma.done.wait [#allocation6], 512  }
  0x26   :  { %158 = vsyncadd [#allocation6], 4294966784  ;;  %v38_v0 = vld [vmem:[#allocation2] sm:$0xff]  ;;  %v39_v2 = vld [vmem:[#allocation2 + $0x8] sm:$0xff]  ;;  %s165_s6 = smov [#allocation7]  }
  0x27   :  { %v46_v1 = vld [vmem:[#allocation5] sm:$0xff]  ;;  %v47_v4 = vld [vmem:[#allocation5 + $0x8] sm:$0xff]  ;;  %v40_v5 = vld [vmem:[#allocation2 + $0x10] sm:$0xff]  ;;  %s71_s7 = sshll.u32 %s165_s6, 4  ;;  %s72_s7 = int_to_ptr.vmem [resolvable:$true] %s71_s7 }
  0x28   :  { %v50_v3 = vadd.f32 %v46_v1, %v38_v0  ;;  %v48_v6 = vld [vmem:[#allocation5 + $0x10] sm:$0xff]  ;;  %v51_v7 = vadd.f32 %v47_v4, %v39_v2  ;;  %v41_v9 = vld [vmem:[#allocation2 + $0x18] sm:$0xff]  ;;  %v42_v11 = vld [vmem:[#allocation2 + $0x20] sm:$0xff]  ;;  %s133_s1 = scalar_lea.vmem %s72_s7, 1024  ;;  %p138_p3 = scmp.lt.s32.totalorder %s72_s7, %s72_s7 }
  0x29   :  { %v52_v8 = vadd.f32 %v48_v6, %v40_v5  ;;  %v49_v10 = vld [vmem:[#allocation5 + $0x18] sm:$0xff]  ;;  %v54_v13 = vadd.f32 %v46_v1, %v42_v11  ;;  %v43_v14 = vld [vmem:[#allocation2 + $0x28] sm:$0xff]  ;;  %v44_v15 = vld [vmem:[#allocation2 + $0x30] sm:$0xff]  ;;  %p134_p2 = scmp.ne.s32.totalorder %s72_s7, %s133_s1  ;;  %p139_p4 = scmp.lt.s32.totalorder %s133_s1, %s133_s1 }
  0x2a   :  { %58 = vst [vmem:[#allocation7] sm:$0xff] %v50_v3  ;;  %v53_v12 = vadd.f32 %v49_v10, %v41_v9  ;;  %v45_v16 = vld [vmem:[#allocation2 + $0x38] sm:$0xff]  ;;  %59 = vst [vmem:[#allocation7 + $0x8] sm:$0xff] %v51_v7  ;;  %v55_v17 = vadd.f32 %v47_v4, %v43_v14  ;;  %v56_v18 = vadd.f32 %v48_v6, %v44_v15 }
  0x2b   :  { %60 = vst [vmem:[#allocation7 + $0x10] sm:$0xff] %v52_v8  ;;  %v57_v19 = vadd.f32 %v49_v10, %v45_v16  ;;  %62 = vst [vmem:[#allocation7 + $0x20] sm:$0xff] %v54_v13  ;;  %p140_p5 = por %p139_p4, %p138_p3 }
  0x2c   :  { %61 = vst [vmem:[#allocation7 + $0x18] sm:$0xff] %v53_v12  ;;  %63 = vst [vmem:[#allocation7 + $0x28] sm:$0xff] %v55_v17 }
  0x2d   :  { %64 = vst [vmem:[#allocation7 + $0x30] sm:$0xff] %v56_v18  ;;  %65 = vst [vmem:[#allocation7 + $0x38] sm:$0xff] %v57_v19  ;;  %p141_p6 = pnand %p140_p5, %p134_p2 }
  0x2f   :  { %144 = shalt.err (!%p141_p6)
}
  0x30   :  { %s145_s10 = scalar_lea.hbm %s225_s2, 1024 }
  0x31   :  { %p146_p7 = scmp.ne.s32.totalorder %s225_s2, %s145_s10  ;;  %p149_p8 = scmp.lt.u32.totalorder %s145_s10, %s225_s2 }
  0x33   :  { %p151_p9 = pnand %p149_p8, %p146_p7 }
  0x35   :  { %154 = shalt.err (!%p151_p9)
}
  0x36   :  { %77 = dma.vmem_to_hbm [thread:$0]  %s72_s7, 1024, %s225_s2, [#allocation4], %s162_s19, %s162_s19, %s163_s20  }
  0x37   :  { %159 = dma.done.wait [#allocation4], 1024  }
  0x38   :  { %160 = vsyncadd [#allocation4], 4294966272 }
  0x39   :  { %81 = vsyncpa [#allocation3], 1 }
  0x3a   :  { %82 = vsyncpa [#allocation6], 1 }
  0x3b   :  { %83 = vsyncpa [#allocation4], 1 }

</bundles_post_ra>
